<compile_context>
chip_gen: v7x
topology: tpu7x:2x2x1
jax: 0.10.0
libtpu: 0.0.40
codegen_flags: <defaults>
</compile_context>

<pallas_src>
import math

import jax
import jax.numpy as jnp
from jax import lax
from jax.experimental import pallas as pl
from jax.experimental.pallas import tpu as pltpu


def _attention_kernel(x_ref, q_ref, o_ref):
    # x_ref: (B*S, I) all batches folded together; q_ref: (I, H); o_ref: (B, S, S)
    B, S, _ = o_ref.shape
    H = q_ref.shape[-1]

    # XQ = x @ Q across all batches in a single MXU matmul (B*S rows per push).
    xq = jnp.dot(x_ref[...], q_ref[...],
                 preferred_element_type=jnp.float32)          # (B*S, H)
    xq = xq.reshape(B, S, H)                                  # lane dim (H) unchanged

    # scores[b] = XQ[b] @ XQ[b]^T as an NT batched dot_general: contraction on
    # the last dim of both operands, batch over dim 0 -> no explicit transpose
    # (no XLU/TRF relayout on the critical path).
    scores = lax.dot_general(
        xq, xq,
        dimension_numbers=(((2,), (2,)), ((0,), (0,))),
        preferred_element_type=jnp.float32)                   # (B, S, S)
    scores = scores * (1.0 / math.sqrt(H))

    # Numerically stable softmax along the last axis, all in f32.
    m = jnp.max(scores, axis=-1, keepdims=True)
    e = jnp.exp(scores - m)
    denom = jnp.sum(e, axis=-1, keepdims=True)
    # approx=False keeps the 1e-5 match with the f32 reference; approx=True
    # (EUP vrcp, effectively free) would add ~2e-4 relative error.
    o_ref[...] = (e * pl.reciprocal(denom, approx=False)).astype(o_ref.dtype)


def attention_net_forward(x, q_param):
    """x: (B, S, I) float32, q_param: (S, H) float32 -> (B, S, S) float32."""
    B, S, I = x.shape
    S2, H = q_param.shape
    assert I == S2, "torch.matmul(x, Q) requires input_size == seq_len"

    # Fold batch into the row dimension of the first matmul (XLA-side reshape of
    # a contiguous array; free). Everything fits in VMEM at these shapes, so a
    # single un-gridded pallas_call with whole-array VMEM blocks is optimal.
    x2d = x.reshape(B * S, I)

    return pl.pallas_call(
        _attention_kernel,
        out_shape=jax.ShapeDtypeStruct((B, S, S), jnp.float32),
        in_specs=[
            pl.BlockSpec(memory_space=pltpu.MemorySpace.VMEM),   # x2d (B*S, I)
            pl.BlockSpec(memory_space=pltpu.MemorySpace.VMEM),   # Q   (I, H)
        ],
        out_specs=pl.BlockSpec(memory_space=pltpu.MemorySpace.VMEM),
        # NOTE: if seq_len ever scales up, re-introduce a (query-tiled) grid
        # with a flash-style online softmax and set vmem_limit_bytes (the f32
        # (S, S) block grows quadratically and would blow v7x's 64 MiB VMEM).
    )(x2d, q_param)


def reference_forward(x, q_param):
    xq = jnp.einsum("bsi,ih->bsh", x, q_param)
    scores = jnp.einsum("bqh,bkh->bqk", xq, xq) / math.sqrt(q_param.shape[-1])
    return jax.nn.softmax(scores, axis=-1)


if __name__ == "__main__":
    # Small, self-consistent shapes: input_size == seq_len (required by the
    # module's own matmul x @ Q), hidden_size lane-aligned.
    batch = 2
    seq_len = 16
    input_size = seq_len
    hidden_size = 128

    key = jax.random.PRNGKey(0)
    kx, kq = jax.random.split(key)

    x = jax.random.normal(kx, (batch, seq_len, input_size), dtype=jnp.float32)

    # reset_parameters(): uniform(-stdv, stdv) with stdv = 1/sqrt(hidden_size)
    stdv = 1.0 / math.sqrt(hidden_size)
    q_param = jax.random.uniform(
        kq, (seq_len, hidden_size), dtype=jnp.float32, minval=-stdv, maxval=stdv)

    out = attention_net_forward(x, q_param)
    out = jax.block_until_ready(out)

    ref = reference_forward(x, q_param)
    assert out.shape == (batch, seq_len, seq_len)
    assert jnp.allclose(out, ref, atol=1e-5, rtol=1e-5), "mismatch vs reference"

    print("KERNEL_OK")
</pallas_src>

<mosaic_0001>
module attributes {stable_mosaic.version = 11 : i64} {
  func.func @_attention_kernel(%arg0: memref<32x16xf32, #tpu.memory_space<vmem>>, %arg1: memref<16x128xf32, #tpu.memory_space<vmem>>, %arg2: memref<2x16x16xf32, #tpu.memory_space<vmem>>) attributes {dimension_semantics = [], scalar_prefetch = 0 : i64, scratch_operands = 0 : i64, tpu.core_type = #tpu.core_type<tc>} {
    %c0 = arith.constant 0 : index
    %c0_0 = arith.constant 0 : index
    %0 = vector.load %arg0[%c0, %c0_0] : memref<32x16xf32, #tpu.memory_space<vmem>>, vector<32x16xf32>
    %c0_1 = arith.constant 0 : index
    %c0_2 = arith.constant 0 : index
    %1 = vector.load %arg1[%c0_1, %c0_2] : memref<16x128xf32, #tpu.memory_space<vmem>>, vector<16x128xf32>
    %cst = arith.constant dense<0.000000e+00> : vector<32x128xf32>
    %2 = tpu.matmul %0, %1, %cst {dimension_numbers = #tpu.dot_dimension_numbers<[1], [0], [0], [1], [0, 0, 1, 1], [], []>} : vector<32x16xf32>, vector<16x128xf32>, vector<32x128xf32> -> vector<32x128xf32>
    %3 = vector.shape_cast %2 : vector<32x128xf32> to vector<2x16x128xf32>
    %cst_3 = arith.constant dense<0.000000e+00> : vector<2x16x16xf32>
    %4 = tpu.matmul %3, %3, %cst_3 {dimension_numbers = #tpu.dot_dimension_numbers<[2], [2], [1], [1], [0, 0, 0, 1, 1, 1], [0], [0]>} : vector<2x16x128xf32>, vector<2x16x128xf32>, vector<2x16x16xf32> -> vector<2x16x16xf32>
    %cst_4 = arith.constant 0.0883883461 : f32
    %5 = vector.broadcast %cst_4 : f32 to vector<2x16x16xf32>
    %6 = arith.mulf %4, %5 : vector<2x16x16xf32>
    %cst_5 = arith.constant dense<0xFF800000> : vector<2x16xf32>
    %7 = vector.multi_reduction <maximumf>, %6, %cst_5 [2] : vector<2x16x16xf32> to vector<2x16xf32>
    %8 = vector.shape_cast %7 : vector<2x16xf32> to vector<2x16x1xf32>
    %9 = vector.broadcast %8 : vector<2x16x1xf32> to vector<2x16x16xf32>
    %10 = arith.subf %6, %9 : vector<2x16x16xf32>
    %11 = math.exp %10 : vector<2x16x16xf32>
    %cst_6 = arith.constant dense<0.000000e+00> : vector<2x16xf32>
    %12 = vector.multi_reduction <add>, %11, %cst_6 [2] : vector<2x16x16xf32> to vector<2x16xf32>
    %13 = vector.shape_cast %12 : vector<2x16xf32> to vector<2x16x1xf32>
    %14 = tpu.reciprocal %13 : vector<2x16x1xf32> -> vector<2x16x1xf32>
    %15 = vector.broadcast %14 : vector<2x16x1xf32> to vector<2x16x16xf32>
    %16 = arith.mulf %11, %15 : vector<2x16x16xf32>
    %c0_7 = arith.constant 0 : index
    %c0_8 = arith.constant 0 : index
    %c0_9 = arith.constant 0 : index
    %17 = vector.load %arg2[%c0_7, %c0_8, %c0_9] : memref<2x16x16xf32, #tpu.memory_space<vmem>>, vector<2x16x16xf32>
    tpu.vector_store %arg2[%c0_7, %c0_8, %c0_9], %16 {strides = array<i32>} : memref<2x16x16xf32, #tpu.memory_space<vmem>>, vector<2x16x16xf32>,
    return
  }
}

</mosaic_0001>

<bundles_post_ra>
// kernel: tpu_custom_call.1
= control target key start
LH: loop header
LB: loop body
LE: loop exit
PB: predicated region body
PF: predicated region fallthrough
CT: control target
= control target key end

     0   :  { %vm18_vm0 = vcmask 130048   ;;  %s495_s0 = inlined_call_operand.vmem [shape: f32[32,16], index: 0, kind: input, shape index: {}]   ;;  %s496_s1 = inlined_call_operand.vmem [shape: f32[16,128], index: 1, kind: input, shape index: {}]   ;;  %s497_s2 = inlined_call_operand.hbm [shape: f32[2,16,16], index: 2, kind: output, shape index: {}]  }
   0x1   :  { %v16_v0 = vld [vmem:[%s496_s1] sm:$0xff]  ;;  %v17_v1 = vld [vmem:[%s496_s1 + $0x8] sm:$0xff] }
   0x2   :  { %v12_v2 = vld [vmem:[%s495_s0] sm:$0xff]  ;;  %v376_v3 = vpack.c.bf16 %v17_v1, %v16_v0 }
   0x3   :  { %356 = vmatprep.mubr.msk.f32.mxu0 %vm18_vm0, %v12_v2 }
   0x4   :  { %7 = vsyncpa [#allocation3], 0  ;;  %377 = vmatprep.subr.bf16.mxu0 %v376_v3  ;;  %v13_v4 = vld [vmem:[%s495_s0 + $0x8] sm:$0xff]  ;;  %v14_v5 = vld [vmem:[%s495_s0 + $0x10] sm:$0xff] }
   0x5   :  { %379 = vmatpush3.bf16.msra.mxu0 %v376_v3  ;;  %v15_v6 = vld [vmem:[%s495_s0 + $0x18] sm:$0xff]  ;;  %s431_s0 = smov [#allocation2]  }
   0x6   :  { %s323_s20 = sshll.u32 %s431_s0, 4  ;;  %s324_s20 = int_to_ptr.vmem [resolvable:$true] %s323_s20 }
   0x7   :  { %s407_s21 = scalar_lea.vmem %s324_s20, 512  ;;  %p412_p1 = scmp.lt.s32.totalorder %s324_s20, %s324_s20 }
   0x8   :  { %357 = vmatmul.mubr.msk.f32.vlgmr.msra.gmra.mrb[0].mxu0 %vm18_vm0, %v13_v4  ;;  %p408_p0 = scmp.ne.s32.totalorder %s324_s20, %s407_s21  ;;  %p413_p2 = scmp.lt.s32.totalorder %s407_s21, %s407_s21 }
   0x9   :  { %359 = vmatprep.mubr.msk.f32.mxu0 %vm18_vm0, %v14_v5 }
   0xa   :  { %p414_p3 = por %p413_p2, %p412_p1 }
   0xc   :  { %360 = vmatmul.mubr.msk.f32.gmra.mrb[2].mxu0 %vm18_vm0, %v15_v6  ;;  %p415_p4 = pnand %p414_p3, %p408_p0 }
  0xdb   :  { %v358_v7 = vpop.f32.mrb[0].mxu0 }
  0xdc   :  { %v97_v8 = vpop.f32.mrb[1].mxu0 }
  0xdd   :  { %366 = vmatprep.mubr.f32.mxu1 %v97_v8  ;;  %v380_v9 = vpack.c.bf16 %v358_v7, %v97_v8 }
  0xdf   :  { %v361_v10 = vpop.f32.mrb[2].mxu0  ;;  %381 = vmatprep.subr.bf16.mxu1 %v380_v9 }
  0xe0   :  { %v107_v11 = vpop.f32.mrb[3].mxu0  ;;  %383 = vmatpush3.bf16.xpose.msra.mxu1 %v380_v9 }
  0xe1   :  { %v384_v12 = vpack.c.bf16 %v361_v10, %v107_v11  ;;  %373 = vmatprep.mubr.f32.mxu0 %v107_v11 }
  0xe3   :  { %385 = vmatprep.subr.bf16.mxu0 %v384_v12 }
  0xe4   :  { %387 = vmatpush3.bf16.xpose.msra.mxu0 %v384_v12 }
  0xe7   :  { %367 = vmatmul.mubr.f32.vlgmr.msra.gmra.mrb[0].mxu1 %v358_v7 }
  0xeb   :  { %374 = vmatmul.mubr.f32.vlgmr.msra.gmra.mrb[4].mxu0 %v361_v10 }
 0x1ba   :  { %v368_v13 = vpop.f32.mrb[0].mxu1 }
 0x1bb   :  { %v182_v14 = vpop.f32.mrb[1].mxu1  ;;  %v267_v16 = vmul.f32 0.088388346, %v368_v13 }
 0x1bc   :  { %v266_v15 = vmul.f32 0.088388346, %v182_v14 }
 0x1bd   :  { %v273_v22 = vsel %vm18_vm0, %v267_v16, -inf }
 0x1be   :  { %v375_v17 = vpop.f32.mrb[4].mxu0  ;;  %v270_v18 = vsel %vm18_vm0, %v266_v15, -inf }
 0x1bf   :  { %271 = vmax.xlane.f32.xlu0 %v270_v18  ;;  %v257_v19 = vpop.f32.mrb[5].mxu0  ;;  %v269_v21 = vmul.f32 0.088388346, %v375_v17 }
 0x1c0   :  { %v268_v20 = vmul.f32 0.088388346, %v257_v19 }
 0x1c1   :  { %v279_v24 = vsel %vm18_vm0, %v269_v21, -inf }
 0x1c2   :  { %v276_v23 = vsel %vm18_vm0, %v268_v20, -inf }
 0x1c3   :  { %274 = vmax.xlane.f32.xlu0 %v273_v22  ;;  %277 = vmax.xlane.f32.xlu1 %v276_v23 }
 0x1c7   :  { %280 = vmax.xlane.f32.xlu1 %v279_v24 }
 0x24c   :  { %v272_v25 = vpop.xlane.xlu0 %271 }
 0x24d   :  { %v282_v26 = vsub.f32 %v266_v15, %v272_v25 }
 0x24f   :  { %v286_v27 = vmul.f32 1.442695, %v282_v26 }
 0x250   :  { %v275_v28 = vpop.xlane.xlu0 %274  ;;  %v278_v29 = vpop.xlane.xlu1 %277 }
 0x251   :  { %391 = vpow2.f32 %v286_v27  ;;  %v283_v30 = vsub.f32 %v267_v16, %v275_v28  ;;  %v284_v31 = vsub.f32 %v268_v20, %v278_v29 }
 0x253   :  { %v288_v32 = vmul.f32 1.442695, %v283_v30  ;;  %v290_v33 = vmul.f32 1.442695, %v284_v31 }
 0x254   :  { %v281_v34 = vpop.xlane.xlu1 %280 }
 0x255   :  { %393 = vpow2.f32 %v288_v32  ;;  %v285_v35 = vsub.f32 %v269_v21, %v281_v34 }
 0x256   :  { %395 = vpow2.f32 %v290_v33 }
 0x257   :  { %v292_v36 = vmul.f32 1.442695, %v285_v35 }
 0x259   :  { %397 = vpow2.f32 %v292_v36 }
 0x25b   :  { %v392_v37 = vpop.eup %391 }
 0x25c   :  { %v294_v38 = vsel %vm18_vm0, %v392_v37, 0.0 }
 0x25d   :  { %295 = vadd.xlane.f32.xlu0 %v294_v38 }
 0x25f   :  { %v394_v39 = vpop.eup %393 }
 0x260   :  { %v396_v40 = vpop.eup %395  ;;  %v297_v41 = vsel %vm18_vm0, %v394_v39, 0.0 }
 0x261   :  { %298 = vadd.xlane.f32.xlu1 %v297_v41  ;;  %v300_v42 = vsel %vm18_vm0, %v396_v40, 0.0 }
 0x262   :  { %301 = vadd.xlane.f32.xlu0 %v300_v42 }
 0x263   :  { %v398_v43 = vpop.eup %397 }
 0x264   :  { %v303_v44 = vsel %vm18_vm0, %v398_v43, 0.0 }
 0x265   :  { %304 = vadd.xlane.f32.xlu1 %v303_v44 }
 0x2ea   :  { %v296_v45 = vpop.xlane.xlu0 %295 }
 0x2eb   :  { %399 = vrcp.f32 %v296_v45 }
 0x2ee   :  { %v299_v46 = vpop.xlane.xlu1 %298 }
 0x2ef   :  { %v302_v47 = vpop.xlane.xlu0 %301  ;;  %401 = vrcp.f32 %v299_v46 }
 0x2f0   :  { %403 = vrcp.f32 %v302_v47 }
 0x2f2   :  { %v305_v48 = vpop.xlane.xlu1 %304 }
 0x2f3   :  { %405 = vrcp.f32 %v305_v48 }
 0x2f5   :  { %v400_v49 = vpop.eup %399 }
 0x2f6   :  { %v310_v50 = vmul.f32 %v400_v49, %v392_v37 }
 0x2f8   :  { %314 = vst.msk [vmem:[#allocation2] sm:$0xff] %vm18_vm0, %v310_v50 }
 0x2f9   :  { %v402_v51 = vpop.eup %401 }
 0x2fa   :  { %v404_v52 = vpop.eup %403  ;;  %v311_v53 = vmul.f32 %v402_v51, %v394_v39 }
 0x2fb   :  { %v312_v54 = vmul.f32 %v404_v52, %v396_v40 }
 0x2fc   :  { %315 = vst.msk [vmem:[#allocation2 + $0x8] sm:$0xff] %vm18_vm0, %v311_v53 }
 0x2fd   :  { %v406_v55 = vpop.eup %405  ;;  %316 = vst.msk [vmem:[#allocation2 + $0x10] sm:$0xff] %vm18_vm0, %v312_v54 }
 0x2fe   :  { %v313_v56 = vmul.f32 %v406_v55, %v398_v43 }
 0x300   :  { %317 = vst.msk [vmem:[#allocation2 + $0x18] sm:$0xff] %vm18_vm0, %v313_v56 }
 0x301   :  { %418 = shalt.err (!%p415_p4)
}
 0x302   :  { %s419_s24 = scalar_lea.hbm %s497_s2, 512 }
 0x303   :  { %p420_p5 = scmp.ne.s32.totalorder %s497_s2, %s419_s24  ;;  %p423_p6 = scmp.lt.u32.totalorder %s419_s24, %s497_s2 }
 0x305   :  { %p425_p7 = pnand %p423_p6, %p420_p5 }
 0x307   :  { %428 = shalt.err (!%p425_p7)
}
 0x308   :  { %s432_s29 = smov 128   ;;  %s433_s30 = smov 8  }
 0x309   :  { %329 = dma.vmem_to_hbm [thread:$0]  %s324_s20, 512, %s497_s2, [#allocation3], %s432_s29, %s432_s29, %s433_s30  }
 0x30a   :  { %429 = dma.done.wait [#allocation3], 512  }
 0x30b   :  { %430 = vsyncadd [#allocation3], 4294966784 }
 0x30c   :  { %333 = vsyncpa [#allocation3], 1 }

</bundles_post_ra>
